<compile_context>
chip_gen: v7x
topology: tpu7x:2x2x1
jax: 0.10.0
libtpu: 0.0.40
codegen_flags: <defaults>
</compile_context>

<pallas_src>
import functools

import jax
import jax.numpy as jnp
from jax import lax
from jax.experimental import pallas as pl
from jax.experimental.pallas import tpu as pltpu


def bilstm_kernel(gx_ref, whh_ref, out_ref, h_ref, c_ref):
    """One (direction, time-chunk) grid step of the bidirectional LSTM.

    gx_ref : (Tc, B, 4H) f32  pre-activations x@W_ih + (b_ih+b_hh) for this
             direction's original-time chunk, gate-major columns [i|f|g|o].
    whh_ref: (H, 4H)          this direction's recurrent weights (W_hh.T).
    out_ref: (Tc, B, H)       hidden states, written at original-time rows.
    h_ref, c_ref: (B, H) f32  VMEM scratch carrying state across time chunks.
    """
    Tc, _, _ = gx_ref.shape
    H = whh_ref.shape[0]
    d = pl.program_id(0)          # 0 = forward direction, 1 = backward

    @pl.when(pl.program_id(1) == 0)
    def _():
        h_ref[...] = jnp.zeros_like(h_ref)
        c_ref[...] = jnp.zeros_like(c_ref)

    def step(s, carry):
        h, c = carry
        # fwd reads/writes row s; bwd reads/writes row Tc-1-s (its chunks are
        # also fetched in reverse order by the index_map), so every hidden
        # state lands directly at its original-time row — one contiguous
        # lane-dense (B, H) store per step.
        r = d * (Tc - 1) + (1 - 2 * d) * s
        gates = gx_ref[r] + jnp.dot(h.astype(whh_ref.dtype), whh_ref[...],
                                    preferred_element_type=jnp.float32)
        i_g = jax.nn.sigmoid(gates[:, 0 * H:1 * H])
        f_g = jax.nn.sigmoid(gates[:, 1 * H:2 * H])
        g_g = jnp.tanh(gates[:, 2 * H:3 * H])
        o_g = jax.nn.sigmoid(gates[:, 3 * H:4 * H])
        c = f_g * c + i_g * g_g
        h = o_g * jnp.tanh(c)
        out_ref[r] = h.astype(out_ref.dtype)
        return h, c

    # TODO(synk): hold W_hh resident in the MXU across the T steps via
    # pltpu.matmul_push_rhs / matmul_acc_lhs / matmul_pop (loop-invariant RHS).
    h, c = lax.fori_loop(0, Tc, step, (h_ref[...], c_ref[...]),
                         unroll=min(8, Tc))
    h_ref[...] = h
    c_ref[...] = c


def _bilstm_pallas(gx, whh, time_chunk, out_dtype):
    """gx: (2, Tp, B, 4H) f32, whh: (2, H, 4H). Returns (2, Tp, B, H)."""
    D, Tp, B, G4 = gx.shape
    H = whh.shape[1]
    Tc = time_chunk
    nt = Tp // Tc

    def tmap(d, t):
        # fwd (d=0): original-time chunk t; bwd (d=1): chunk nt-1-t, so the
        # backward recurrence walks original time from the end with no
        # pre-reversed copy of gx in HBM.
        return (d, d * (nt - 1) + (1 - 2 * d) * t, 0, 0)

    return pl.pallas_call(
        bilstm_kernel,
        out_shape=jax.ShapeDtypeStruct((D, Tp, B, H), out_dtype),
        grid_spec=pltpu.PrefetchScalarGridSpec(
            num_scalar_prefetch=0,
            grid=(D, nt),
            in_specs=[
                pl.BlockSpec((None, Tc, B, G4), tmap),
                pl.BlockSpec((None, H, G4), lambda d, t: (d, 0, 0)),
            ],
            out_specs=pl.BlockSpec((None, Tc, B, H), tmap),
            scratch_shapes=[pltpu.VMEM((B, H), jnp.float32),
                            pltpu.VMEM((B, H), jnp.float32)],
        ),
        compiler_params=pltpu.CompilerParams(
            # direction axis is independent work (megacore split on v7x);
            # the time axis carries the recurrence.
            dimension_semantics=("parallel", "arbitrary")),
    )(gx, whh)


@functools.partial(jax.jit, static_argnames=("time_chunk",))
def bilstm_forward(x, params, *, time_chunk=64):
    """x: (B, T, F) batch-first (PyTorch layout). Returns (B, T, 2H)."""
    B, T, F = x.shape
    H = params["w_hh_f"].shape[1]

    Tc = min(T, time_chunk)
    nt = pl.cdiv(T, Tc)
    Tp = nt * Tc

    # ---- hoisted input projection: one einsum for both directions ---------
    # PyTorch LSTM weights are (4H, F)/(4H, H) with gate-major rows [i|f|g|o];
    # transposing already gives the kernel's column layout — no reshuffle.
    w_ih = jnp.stack([params["w_ih_f"].T, params["w_ih_b"].T])      # (2, F, 4H)
    b = jnp.stack([params["b_ih_f"] + params["b_hh_f"],
                   params["b_ih_b"] + params["b_hh_b"]])            # (2, 4H)
    whh = jnp.stack([params["w_hh_f"].T, params["w_hh_b"].T])       # (2, H, 4H)

    gx = jnp.einsum("btf,dfg->dtbg", x, w_ih,
                    preferred_element_type=jnp.float32)
    gx = gx + b[:, None, None, :]                                   # (2,T,B,4H)

    # Zero-pad time to a multiple of Tc.  A zero pre-activation row with zero
    # state gives g = tanh(0) = 0, so c stays 0 and h stays 0: padded steps
    # are exact no-ops for the backward direction (which sees them first) and
    # dead rows (sliced off) for the forward direction.
    if Tp != T:
        gx = jnp.pad(gx, ((0, 0), (0, Tp - T), (0, 0), (0, 0)))
    # TODO(synk): keep gx in bf16 (add in f32 in-kernel) to halve HBM traffic.
    # TODO(synk): pad B up to the sublane count (8) to fill the MXU LHS rows.

    out = _bilstm_pallas(gx, whh, Tc, x.dtype)                      # (2,Tp,B,H)
    out = jnp.concatenate([out[0, :T], out[1, :T]], axis=-1)        # (T, B, 2H)
    return jnp.transpose(out, (1, 0, 2))                            # (B, T, 2H)


# ---- pure-JAX reference (lax.scan) for correctness check -------------------
def _ref_dir(x_tm, w_ih, w_hh, b_ih, b_hh, reverse):
    T, B, F = x_tm.shape
    H = w_hh.shape[1]
    xs = x_tm[::-1] if reverse else x_tm

    def step(carry, x_t):
        h, c = carry
        gates = x_t @ w_ih.T + h @ w_hh.T + b_ih + b_hh
        i, f, g, o = jnp.split(gates, 4, axis=-1)
        i, f, o = jax.nn.sigmoid(i), jax.nn.sigmoid(f), jax.nn.sigmoid(o)
        g = jnp.tanh(g)
        c = f * c + i * g
        h = o * jnp.tanh(c)
        return (h, c), h

    init = (jnp.zeros((B, H), jnp.float32), jnp.zeros((B, H), jnp.float32))
    _, hs = jax.lax.scan(step, init, xs)
    return hs[::-1] if reverse else hs


def bilstm_reference(x, params):
    x_tm = jnp.transpose(x, (1, 0, 2))
    f = _ref_dir(x_tm, params["w_ih_f"], params["w_hh_f"],
                 params["b_ih_f"], params["b_hh_f"], False)
    b = _ref_dir(x_tm, params["w_ih_b"], params["w_hh_b"],
                 params["b_ih_b"], params["b_hh_b"], True)
    return jnp.transpose(jnp.concatenate([f, b], axis=-1), (1, 0, 2))


if __name__ == "__main__":
    # Small shapes consistent with the module's forward pass.
    batch, seq_len = 2, 8
    input_features, recurrent_features = 16, 32
    H, F = recurrent_features, input_features

    key = jax.random.PRNGKey(0)
    keys = jax.random.split(key, 10)
    bound = 1.0 / jnp.sqrt(H)  # PyTorch LSTM default init: U(-1/sqrt(H), 1/sqrt(H))

    def u(k, shape):
        return jax.random.uniform(k, shape, jnp.float32, -bound, bound)

    params = {
        "w_ih_f": u(keys[0], (4 * H, F)),
        "w_hh_f": u(keys[1], (4 * H, H)),
        "b_ih_f": u(keys[2], (4 * H,)),
        "b_hh_f": u(keys[3], (4 * H,)),
        "w_ih_b": u(keys[4], (4 * H, F)),
        "w_hh_b": u(keys[5], (4 * H, H)),
        "b_ih_b": u(keys[6], (4 * H,)),
        "b_hh_b": u(keys[7], (4 * H,)),
    }

    # Test 1: single time chunk (T <= time_chunk).
    x = jax.random.normal(keys[8], (batch, seq_len, input_features), jnp.float32)
    out = jax.block_until_ready(bilstm_forward(x, params))
    assert out.shape == (batch, seq_len, 2 * recurrent_features), out.shape
    ref = jax.block_until_ready(bilstm_reference(x, params))
    assert jnp.allclose(out, ref, atol=1e-4, rtol=1e-4), (
        float(jnp.max(jnp.abs(out - ref))))

    # Test 2: multi-chunk + time-padding path (T=11 with chunk=4 -> 3 chunks).
    x2 = jax.random.normal(keys[9], (batch, 11, input_features), jnp.float32)
    out2 = jax.block_until_ready(bilstm_forward(x2, params, time_chunk=4))
    ref2 = jax.block_until_ready(bilstm_reference(x2, params))
    assert out2.shape == (batch, 11, 2 * recurrent_features), out2.shape
    assert jnp.allclose(out2, ref2, atol=1e-4, rtol=1e-4), (
        float(jnp.max(jnp.abs(out2 - ref2))))

    print("KERNEL_OK")
</pallas_src>

<mosaic_0001>
module attributes {stable_mosaic.version = 11 : i64} {
  func.func @bilstm_kernel(%arg0: i32, %arg1: i32, %arg2: memref<1x8x2x128xf32, #tpu.memory_space<vmem>>, %arg3: memref<1x32x128xf32, #tpu.memory_space<vmem>>, %arg4: memref<1x8x2x32xf32, #tpu.memory_space<vmem>>, %arg5: memref<2x32xf32, #tpu.memory_space<vmem>>, %arg6: memref<2x32xf32, #tpu.memory_space<vmem>>) attributes {dimension_semantics = [#tpu.dimension_semantics<parallel>, #tpu.dimension_semantics<arbitrary>], iteration_bounds = array<i64: 2, 1>, scalar_prefetch = 0 : i64, scratch_operands = 2 : i64, tpu.core_type = #tpu.core_type<tc>, window_params = [{transform_indices = @transform_0, window_bounds = array<i64: 1, 8, 2, 128>}, {transform_indices = @transform_1, window_bounds = array<i64: 1, 32, 128>}, {transform_indices = @transform_2, window_bounds = array<i64: 1, 8, 2, 32>}]} {
    %c0_i32 = arith.constant 0 : i32
    %0 = arith.cmpi eq, %arg1, %c0_i32 : i32
    %1 = arith.extui %0 : i1 to i32
    %c0_i32_0 = arith.constant 0 : i32
    %2 = arith.cmpi ne, %1, %c0_i32_0 : i32
    scf.if %2 {
      %cst_136 = arith.constant 0.000000e+00 : f32
      %335 = vector.broadcast %cst_136 : f32 to vector<2x32xf32>
      %c0_137 = arith.constant 0 : index
      %c0_138 = arith.constant 0 : index
      %336 = vector.load %arg5[%c0_137, %c0_138] : memref<2x32xf32, #tpu.memory_space<vmem>>, vector<2x32xf32>
      tpu.vector_store %arg5[%c0_137, %c0_138], %335 {strides = array<i32>} : memref<2x32xf32, #tpu.memory_space<vmem>>, vector<2x32xf32>,
      %cst_139 = arith.constant 0.000000e+00 : f32
      %337 = vector.broadcast %cst_139 : f32 to vector<2x32xf32>
      %c0_140 = arith.constant 0 : index
      %c0_141 = arith.constant 0 : index
      %338 = vector.load %arg6[%c0_140, %c0_141] : memref<2x32xf32, #tpu.memory_space<vmem>>, vector<2x32xf32>
      tpu.vector_store %arg6[%c0_140, %c0_141], %337 {strides = array<i32>} : memref<2x32xf32, #tpu.memory_space<vmem>>, vector<2x32xf32>,
    } else {
    }
    %c0 = arith.constant 0 : index
    %c0_1 = arith.constant 0 : index
    %3 = vector.load %arg5[%c0, %c0_1] : memref<2x32xf32, #tpu.memory_space<vmem>>, vector<2x32xf32>
    %c0_2 = arith.constant 0 : index
    %c0_3 = arith.constant 0 : index
    %4 = vector.load %arg6[%c0_2, %c0_3] : memref<2x32xf32, #tpu.memory_space<vmem>>, vector<2x32xf32>
    %c0_i32_4 = arith.constant 0 : i32
    %c7_i32 = arith.constant 7 : i32
    %5 = arith.muli %arg0, %c7_i32 : i32
    %c2_i32 = arith.constant 2 : i32
    %6 = arith.muli %c2_i32, %arg0 : i32
    %c1_i32 = arith.constant 1 : i32
    %7 = arith.subi %c1_i32, %6 : i32
    %8 = arith.muli %7, %c0_i32_4 : i32
    %9 = arith.addi %5, %8 : i32
    %c0_5 = arith.constant 0 : index
    %10 = arith.index_cast %9 : i32 to index
    %c0_6 = arith.constant 0 : index
    %c0_7 = arith.constant 0 : index
    %11 = vector.load %arg2[%c0_5, %10, %c0_6, %c0_7] : memref<1x8x2x128xf32, #tpu.memory_space<vmem>>, vector<1x1x2x128xf32>
    %12 = vector.shape_cast %11 : vector<1x1x2x128xf32> to vector<2x128xf32>
    %c0_8 = arith.constant 0 : index
    %c0_9 = arith.constant 0 : index
    %c0_10 = arith.constant 0 : index
    %13 = vector.load %arg3[%c0_8, %c0_9, %c0_10] : memref<1x32x128xf32, #tpu.memory_space<vmem>>, vector<1x32x128xf32>
    %14 = vector.shape_cast %13 : vector<1x32x128xf32> to vector<32x128xf32>
    %cst = arith.constant dense<0.000000e+00> : vector<2x128xf32>
    %15 = tpu.matmul %3, %14, %cst {dimension_numbers = #tpu.dot_dimension_numbers<[1], [0], [0], [1], [0, 0, 1, 1], [], []>} : vector<2x32xf32>, vector<32x128xf32>, vector<2x128xf32> -> vector<2x128xf32>
    %16 = arith.addf %12, %15 : vector<2x128xf32>
    %17 = vector.extract_strided_slice %16 {offsets = [0, 0], sizes = [2, 32], strides = [1, 1]} : vector<2x128xf32> to vector<2x32xf32>
    %18 = arith.negf %17 : vector<2x32xf32>
    %19 = math.exp %18 : vector<2x32xf32>
    %cst_11 = arith.constant 1.000000e+00 : f32
    %20 = vector.broadcast %cst_11 : f32 to vector<2x32xf32>
    %21 = arith.addf %20, %19 : vector<2x32xf32>
    %22 = arith.divf %20, %21 : vector<2x32xf32>
    %23 = vector.extract_strided_slice %16 {offsets = [0, 32], sizes = [2, 32], strides = [1, 1]} : vector<2x128xf32> to vector<2x32xf32>
    %24 = arith.negf %23 : vector<2x32xf32>
    %25 = math.exp %24 : vector<2x32xf32>
    %cst_12 = arith.constant 1.000000e+00 : f32
    %26 = vector.broadcast %cst_12 : f32 to vector<2x32xf32>
    %27 = arith.addf %26, %25 : vector<2x32xf32>
    %28 = arith.divf %26, %27 : vector<2x32xf32>
    %29 = vector.extract_strided_slice %16 {offsets = [0, 64], sizes = [2, 32], strides = [1, 1]} : vector<2x128xf32> to vector<2x32xf32>
    %30 = math.tanh %29 : vector<2x32xf32>
    %31 = vector.extract_strided_slice %16 {offsets = [0, 96], sizes = [2, 32], strides = [1, 1]} : vector<2x128xf32> to vector<2x32xf32>
    %32 = arith.negf %31 : vector<2x32xf32>
    %33 = math.exp %32 : vector<2x32xf32>
    %cst_13 = arith.constant 1.000000e+00 : f32
    %34 = vector.broadcast %cst_13 : f32 to vector<2x32xf32>
    %35 = arith.addf %34, %33 : vector<2x32xf32>
    %36 = arith.divf %34, %35 : vector<2x32xf32>
    %37 = arith.mulf %28, %4 : vector<2x32xf32>
    %38 = arith.mulf %22, %30 : vector<2x32xf32>
    %39 = arith.addf %37, %38 : vector<2x32xf32>
    %40 = math.tanh %39 : vector<2x32xf32>
    %41 = arith.mulf %36, %40 : vector<2x32xf32>
    %c0_14 = arith.constant 0 : index
    %42 = arith.index_cast %9 : i32 to index
    %c0_15 = arith.constant 0 : index
    %c0_16 = arith.constant 0 : index
    %43 = vector.load %arg4[%c0_14, %42, %c0_15, %c0_16] : memref<1x8x2x32xf32, #tpu.memory_space<vmem>>, vector<1x1x2x32xf32>
    %44 = vector.shape_cast %43 : vector<1x1x2x32xf32> to vector<2x32xf32>
    %45 = vector.shape_cast %41 : vector<2x32xf32> to vector<1x1x2x32xf32>
    tpu.vector_store %arg4[%c0_14, %42, %c0_15, %c0_16], %45 {strides = array<i32>} : memref<1x8x2x32xf32, #tpu.memory_space<vmem>>, vector<1x1x2x32xf32>,
    %c1_i32_17 = arith.constant 1 : i32
    %c7_i32_18 = arith.constant 7 : i32
    %46 = arith.muli %arg0, %c7_i32_18 : i32
    %c2_i32_19 = arith.constant 2 : i32
    %47 = arith.muli %c2_i32_19, %arg0 : i32
    %c1_i32_20 = arith.constant 1 : i32
    %48 = arith.subi %c1_i32_20, %47 : i32
    %49 = arith.muli %48, %c1_i32_17 : i32
    %50 = arith.addi %46, %49 : i32
    %c0_21 = arith.constant 0 : index
    %51 = arith.index_cast %50 : i32 to index
    %c0_22 = arith.constant 0 : index
    %c0_23 = arith.constant 0 : index
    %52 = vector.load %arg2[%c0_21, %51, %c0_22, %c0_23] : memref<1x8x2x128xf32, #tpu.memory_space<vmem>>, vector<1x1x2x128xf32>
    %53 = vector.shape_cast %52 : vector<1x1x2x128xf32> to vector<2x128xf32>
    %c0_24 = arith.constant 0 : index
    %c0_25 = arith.constant 0 : index
    %c0_26 = arith.constant 0 : index
    %54 = vector.load %arg3[%c0_24, %c0_25, %c0_26] : memref<1x32x128xf32, #tpu.memory_space<vmem>>, vector<1x32x128xf32>
    %55 = vector.shape_cast %54 : vector<1x32x128xf32> to vector<32x128xf32>
    %cst_27 = arith.constant dense<0.000000e+00> : vector<2x128xf32>
    %56 = tpu.matmul %41, %55, %cst_27 {dimension_numbers = #tpu.dot_dimension_numbers<[1], [0], [0], [1], [0, 0, 1, 1], [], []>} : vector<2x32xf32>, vector<32x128xf32>, vector<2x128xf32> -> vector<2x128xf32>
    %57 = arith.addf %53, %56 : vector<2x128xf32>
    %58 = vector.extract_strided_slice %57 {offsets = [0, 0], sizes = [2, 32], strides = [1, 1]} : vector<2x128xf32> to vector<2x32xf32>
    %59 = arith.negf %58 : vector<2x32xf32>
    %60 = math.exp %59 : vector<2x32xf32>
    %cst_28 = arith.constant 1.000000e+00 : f32
    %61 = vector.broadcast %cst_28 : f32 to vector<2x32xf32>
    %62 = arith.addf %61, %60 : vector<2x32xf32>
    %63 = arith.divf %61, %62 : vector<2x32xf32>
    %64 = vector.extract_strided_slice %57 {offsets = [0, 32], sizes = [2, 32], strides = [1, 1]} : vector<2x128xf32> to vector<2x32xf32>
    %65 = arith.negf %64 : vector<2x32xf32>
    %66 = math.exp %65 : vector<2x32xf32>
    %cst_29 = arith.constant 1.000000e+00 : f32
    %67 = vector.broadcast %cst_29 : f32 to vector<2x32xf32>
    %68 = arith.addf %67, %66 : vector<2x32xf32>
    %69 = arith.divf %67, %68 : vector<2x32xf32>
    %70 = vector.extract_strided_slice %57 {offsets = [0, 64], sizes = [2, 32], strides = [1, 1]} : vector<2x128xf32> to vector<2x32xf32>
    %71 = math.tanh %70 : vector<2x32xf32>
    %72 = vector.extract_strided_slice %57 {offsets = [0, 96], sizes = [2, 32], strides = [1, 1]} : vector<2x128xf32> to vector<2x32xf32>
    %73 = arith.negf %72 : vector<2x32xf32>
    %74 = math.exp %73 : vector<2x32xf32>
    %cst_30 = arith.constant 1.000000e+00 : f32
    %75 = vector.broadcast %cst_30 : f32 to vector<2x32xf32>
    %76 = arith.addf %75, %74 : vector<2x32xf32>
    %77 = arith.divf %75, %76 : vector<2x32xf32>
    %78 = arith.mulf %69, %39 : vector<2x32xf32>
    %79 = arith.mulf %63, %71 : vector<2x32xf32>
    %80 = arith.addf %78, %79 : vector<2x32xf32>
    %81 = math.tanh %80 : vector<2x32xf32>
    %82 = arith.mulf %77, %81 : vector<2x32xf32>
    %c0_31 = arith.constant 0 : index
    %83 = arith.index_cast %50 : i32 to index
    %c0_32 = arith.constant 0 : index
    %c0_33 = arith.constant 0 : index
    %84 = vector.load %arg4[%c0_31, %83, %c0_32, %c0_33] : memref<1x8x2x32xf32, #tpu.memory_space<vmem>>, vector<1x1x2x32xf32>
    %85 = vector.shape_cast %84 : vector<1x1x2x32xf32> to vector<2x32xf32>
    %86 = vector.shape_cast %82 : vector<2x32xf32> to vector<1x1x2x32xf32>
    tpu.vector_store %arg4[%c0_31, %83, %c0_32, %c0_33], %86 {strides = array<i32>} : memref<1x8x2x32xf32, #tpu.memory_space<vmem>>, vector<1x1x2x32xf32>,
    %c2_i32_34 = arith.constant 2 : i32
    %c7_i32_35 = arith.constant 7 : i32
    %87 = arith.muli %arg0, %c7_i32_35 : i32
    %c2_i32_36 = arith.constant 2 : i32
    %88 = arith.muli %c2_i32_36, %arg0 : i32
    %c1_i32_37 = arith.constant 1 : i32
    %89 = arith.subi %c1_i32_37, %88 : i32
    %90 = arith.muli %89, %c2_i32_34 : i32
    %91 = arith.addi %87, %90 : i32
    %c0_38 = arith.constant 0 : index
    %92 = arith.index_cast %91 : i32 to index
    %c0_39 = arith.constant 0 : index
    %c0_40 = arith.constant 0 : index
    %93 = vector.load %arg2[%c0_38, %92, %c0_39, %c0_40] : memref<1x8x2x128xf32, #tpu.memory_space<vmem>>, vector<1x1x2x128xf32>
    %94 = vector.shape_cast %93 : vector<1x1x2x128xf32> to vector<2x128xf32>
    %c0_41 = arith.constant 0 : index
    %c0_42 = arith.constant 0 : index
    %c0_43 = arith.constant 0 : index
    %95 = vector.load %arg3[%c0_41, %c0_42, %c0_43] : memref<1x32x128xf32, #tpu.memory_space<vmem>>, vector<1x32x128xf32>
    %96 = vector.shape_cast %95 : vector<1x32x128xf32> to vector<32x128xf32>
    %cst_44 = arith.constant dense<0.000000e+00> : vector<2x128xf32>
    %97 = tpu.matmul %82, %96, %cst_44 {dimension_numbers = #tpu.dot_dimension_numbers<[1], [0], [0], [1], [0, 0, 1, 1], [], []>} : vector<2x32xf32>, vector<32x128xf32>, vector<2x128xf32> -> vector<2x128xf32>
    %98 = arith.addf %94, %97 : vector<2x128xf32>
    %99 = vector.extract_strided_slice %98 {offsets = [0, 0], sizes = [2, 32], strides = [1, 1]} : vector<2x128xf32> to vector<2x32xf32>
    %100 = arith.negf %99 : vector<2x32xf32>
    %101 = math.exp %100 : vector<2x32xf32>
    %cst_45 = arith.constant 1.000000e+00 : f32
    %102 = vector.broadcast %cst_45 : f32 to vector<2x32xf32>
    %103 = arith.addf %102, %101 : vector<2x32xf32>
    %104 = arith.divf %102, %103 : vector<2x32xf32>
    %105 = vector.extract_strided_slice %98 {offsets = [0, 32], sizes = [2, 32], strides = [1, 1]} : vector<2x128xf32> to vector<2x32xf32>
    %106 = arith.negf %105 : vector<2x32xf32>
    %107 = math.exp %106 : vector<2x32xf32>
    %cst_46 = arith.constant 1.000000e+00 : f32
    %108 = vector.broadcast %cst_46 : f32 to vector<2x32xf32>
    %109 = arith.addf %108, %107 : vector<2x32xf32>
    %110 = arith.divf %108, %109 : vector<2x32xf32>
    %111 = vector.extract_strided_slice %98 {offsets = [0, 64], sizes = [2, 32], strides = [1, 1]} : vector<2x128xf32> to vector<2x32xf32>
    %112 = math.tanh %111 : vector<2x32xf32>
    %113 = vector.extract_strided_slice %98 {offsets = [0, 96], sizes = [2, 32], strides = [1, 1]} : vector<2x128xf32> to vector<2x32xf32>
    %114 = arith.negf %113 : vector<2x32xf32>
    %115 = math.exp %114 : vector<2x32xf32>
    %cst_47 = arith.constant 1.000000e+00 : f32
    %116 = vector.broadcast %cst_47 : f32 to vector<2x32xf32>
    %117 = arith.addf %116, %115 : vector<2x32xf32>
    %118 = arith.divf %116, %117 : vector<2x32xf32>
    %119 = arith.mulf %110, %80 : vector<2x32xf32>
    %120 = arith.mulf %104, %112 : vector<2x32xf32>
    %121 = arith.addf %119, %120 : vector<2x32xf32>
    %122 = math.tanh %121 : vector<2x32xf32>
    %123 = arith.mulf %118, %122 : vector<2x32xf32>
    %c0_48 = arith.constant 0 : index
    %124 = arith.index_cast %91 : i32 to index
    %c0_49 = arith.constant 0 : index
    %c0_50 = arith.constant 0 : index
    %125 = vector.load %arg4[%c0_48, %124, %c0_49, %c0_50] : memref<1x8x2x32xf32, #tpu.memory_space<vmem>>, vector<1x1x2x32xf32>
    %126 = vector.shape_cast %125 : vector<1x1x2x32xf32> to vector<2x32xf32>
    %127 = vector.shape_cast %123 : vector<2x32xf32> to vector<1x1x2x32xf32>
    tpu.vector_store %arg4[%c0_48, %124, %c0_49, %c0_50], %127 {strides = array<i32>} : memref<1x8x2x32xf32, #tpu.memory_space<vmem>>, vector<1x1x2x32xf32>,
    %c3_i32 = arith.constant 3 : i32
    %c7_i32_51 = arith.constant 7 : i32
    %128 = arith.muli %arg0, %c7_i32_51 : i32
    %c2_i32_52 = arith.constant 2 : i32
    %129 = arith.muli %c2_i32_52, %arg0 : i32
    %c1_i32_53 = arith.constant 1 : i32
    %130 = arith.subi %c1_i32_53, %129 : i32
    %131 = arith.muli %130, %c3_i32 : i32
    %132 = arith.addi %128, %131 : i32
    %c0_54 = arith.constant 0 : index
    %133 = arith.index_cast %132 : i32 to index
    %c0_55 = arith.constant 0 : index
    %c0_56 = arith.constant 0 : index
    %134 = vector.load %arg2[%c0_54, %133, %c0_55, %c0_56] : memref<1x8x2x128xf32, #tpu.memory_space<vmem>>, vector<1x1x2x128xf32>
    %135 = vector.shape_cast %134 : vector<1x1x2x128xf32> to vector<2x128xf32>
    %c0_57 = arith.constant 0 : index
    %c0_58 = arith.constant 0 : index
    %c0_59 = arith.constant 0 : index
    %136 = vector.load %arg3[%c0_57, %c0_58, %c0_59] : memref<1x32x128xf32, #tpu.memory_space<vmem>>, vector<1x32x128xf32>
    %137 = vector.shape_cast %136 : vector<1x32x128xf32> to vector<32x128xf32>
    %cst_60 = arith.constant dense<0.000000e+00> : vector<2x128xf32>
    %138 = tpu.matmul %123, %137, %cst_60 {dimension_numbers = #tpu.dot_dimension_numbers<[1], [0], [0], [1], [0, 0, 1, 1], [], []>} : vector<2x32xf32>, vector<32x128xf32>, vector<2x128xf32> -> vector<2x128xf32>
    %139 = arith.addf %135, %138 : vector<2x128xf32>
    %140 = vector.extract_strided_slice %139 {offsets = [0, 0], sizes = [2, 32], strides = [1, 1]} : vector<2x128xf32> to vector<2x32xf32>
    %141 = arith.negf %140 : vector<2x32xf32>
    %142 = math.exp %141 : vector<2x32xf32>
    %cst_61 = arith.constant 1.000000e+00 : f32
    %143 = vector.broadcast %cst_61 : f32 to vector<2x32xf32>
    %144 = arith.addf %143, %142 : vector<2x32xf32>
    %145 = arith.divf %143, %144 : vector<2x32xf32>
    %146 = vector.extract_strided_slice %139 {offsets = [0, 32], sizes = [2, 32], strides = [1, 1]} : vector<2x128xf32> to vector<2x32xf32>
    %147 = arith.negf %146 : vector<2x32xf32>
    %148 = math.exp %147 : vector<2x32xf32>
    %cst_62 = arith.constant 1.000000e+00 : f32
    %149 = vector.broadcast %cst_62 : f32 to vector<2x32xf32>
    %150 = arith.addf %149, %148 : vector<2x32xf32>
    %151 = arith.divf %149, %150 : vector<2x32xf32>
    %152 = vector.extract_strided_slice %139 {offsets = [0, 64], sizes = [2, 32], strides = [1, 1]} : vector<2x128xf32> to vector<2x32xf32>
    %153 = math.tanh %152 : vector<2x32xf32>
    %154 = vector.extract_strided_slice %139 {offsets = [0, 96], sizes = [2, 32], strides = [1, 1]} : vector<2x128xf32> to vector<2x32xf32>
    %155 = arith.negf %154 : vector<2x32xf32>
    %156 = math.exp %155 : vector<2x32xf32>
    %cst_63 = arith.constant 1.000000e+00 : f32
    %157 = vector.broadcast %cst_63 : f32 to vector<2x32xf32>
    %158 = arith.addf %157, %156 : vector<2x32xf32>
    %159 = arith.divf %157, %158 : vector<2x32xf32>
    %160 = arith.mulf %151, %121 : vector<2x32xf32>
    %161 = arith.mulf %145, %153 : vector<2x32xf32>
    %162 = arith.addf %160, %161 : vector<2x32xf32>
    %163 = math.tanh %162 : vector<2x32xf32>
    %164 = arith.mulf %159, %163 : vector<2x32xf32>
    %c0_64 = arith.constant 0 : index
    %165 = arith.index_cast %132 : i32 to index
    %c0_65 = arith.constant 0 : index
    %c0_66 = arith.constant 0 : index
    %166 = vector.load %arg4[%c0_64, %165, %c0_65, %c0_66] : memref<1x8x2x32xf32, #tpu.memory_space<vmem>>, vector<1x1x2x32xf32>
    %167 = vector.shape_cast %166 : vector<1x1x2x32xf32> to vector<2x32xf32>
    %168 = vector.shape_cast %164 : vector<2x32xf32> to vector<1x1x2x32xf32>
    tpu.vector_store %arg4[%c0_64, %165, %c0_65, %c0_66], %168 {strides = array<i32>} : memref<1x8x2x32xf32, #tpu.memory_space<vmem>>, vector<1x1x2x32xf32>,
    %c4_i32 = arith.constant 4 : i32
    %c7_i32_67 = arith.constant 7 : i32
    %169 = arith.muli %arg0, %c7_i32_67 : i32
    %c2_i32_68 = arith.constant 2 : i32
    %170 = arith.muli %c2_i32_68, %arg0 : i32
    %c1_i32_69 = arith.constant 1 : i32
    %171 = arith.subi %c1_i32_69, %170 : i32
    %172 = arith.muli %171, %c4_i32 : i32
    %173 = arith.addi %169, %172 : i32
    %c0_70 = arith.constant 0 : index
    %174 = arith.index_cast %173 : i32 to index
    %c0_71 = arith.constant 0 : index
    %c0_72 = arith.constant 0 : index
    %175 = vector.load %arg2[%c0_70, %174, %c0_71, %c0_72] : memref<1x8x2x128xf32, #tpu.memory_space<vmem>>, vector<1x1x2x128xf32>
    %176 = vector.shape_cast %175 : vector<1x1x2x128xf32> to vector<2x128xf32>
    %c0_73 = arith.constant 0 : index
    %c0_74 = arith.constant 0 : index
    %c0_75 = arith.constant 0 : index
    %177 = vector.load %arg3[%c0_73, %c0_74, %c0_75] : memref<1x32x128xf32, #tpu.memory_space<vmem>>, vector<1x32x128xf32>
    %178 = vector.shape_cast %177 : vector<1x32x128xf32> to vector<32x128xf32>
    %cst_76 = arith.constant dense<0.000000e+00> : vector<2x128xf32>
    %179 = tpu.matmul %164, %178, %cst_76 {dimension_numbers = #tpu.dot_dimension_numbers<[1], [0], [0], [1], [0, 0, 1, 1], [], []>} : vector<2x32xf32>, vector<32x128xf32>, vector<2x128xf32> -> vector<2x128xf32>
    %180 = arith.addf %176, %179 : vector<2x128xf32>
    %181 = vector.extract_strided_slice %180 {offsets = [0, 0], sizes = [2, 32], strides = [1, 1]} : vector<2x128xf32> to vector<2x32xf32>
    %182 = arith.negf %181 : vector<2x32xf32>
    %183 = math.exp %182 : vector<2x32xf32>
    %cst_77 = arith.constant 1.000000e+00 : f32
    %184 = vector.broadcast %cst_77 : f32 to vector<2x32xf32>
    %185 = arith.addf %184, %183 : vector<2x32xf32>
    %186 = arith.divf %184, %185 : vector<2x32xf32>
    %187 = vector.extract_strided_slice %180 {offsets = [0, 32], sizes = [2, 32], strides = [1, 1]} : vector<2x128xf32> to vector<2x32xf32>
    %188 = arith.negf %187 : vector<2x32xf32>
    %189 = math.exp %188 : vector<2x32xf32>
    %cst_78 = arith.constant 1.000000e+00 : f32
    %190 = vector.broadcast %cst_78 : f32 to vector<2x32xf32>
    %191 = arith.addf %190, %189 : vector<2x32xf32>
    %192 = arith.divf %190, %191 : vector<2x32xf32>
    %193 = vector.extract_strided_slice %180 {offsets = [0, 64], sizes = [2, 32], strides = [1, 1]} : vector<2x128xf32> to vector<2x32xf32>
    %194 = math.tanh %193 : vector<2x32xf32>
    %195 = vector.extract_strided_slice %180 {offsets = [0, 96], sizes = [2, 32], strides = [1, 1]} : vector<2x128xf32> to vector<2x32xf32>
    %196 = arith.negf %195 : vector<2x32xf32>
    %197 = math.exp %196 : vector<2x32xf32>
    %cst_79 = arith.constant 1.000000e+00 : f32
    %198 = vector.broadcast %cst_79 : f32 to vector<2x32xf32>
    %199 = arith.addf %198, %197 : vector<2x32xf32>
    %200 = arith.divf %198, %199 : vector<2x32xf32>
    %201 = arith.mulf %192, %162 : vector<2x32xf32>
    %202 = arith.mulf %186, %194 : vector<2x32xf32>
    %203 = arith.addf %201, %202 : vector<2x32xf32>
    %204 = math.tanh %203 : vector<2x32xf32>
    %205 = arith.mulf %200, %204 : vector<2x32xf32>
    %c0_80 = arith.constant 0 : index
    %206 = arith.index_cast %173 : i32 to index
    %c0_81 = arith.constant 0 : index
    %c0_82 = arith.constant 0 : index
    %207 = vector.load %arg4[%c0_80, %206, %c0_81, %c0_82] : memref<1x8x2x32xf32, #tpu.memory_space<vmem>>, vector<1x1x2x32xf32>
    %208 = vector.shape_cast %207 : vector<1x1x2x32xf32> to vector<2x32xf32>
    %209 = vector.shape_cast %205 : vector<2x32xf32> to vector<1x1x2x32xf32>
    tpu.vector_store %arg4[%c0_80, %206, %c0_81, %c0_82], %209 {strides = array<i32>} : memref<1x8x2x32xf32, #tpu.memory_space<vmem>>, vector<1x1x2x32xf32>,
    %c5_i32 = arith.constant 5 : i32
    %c7_i32_83 = arith.constant 7 : i32
    %210 = arith.muli %arg0, %c7_i32_83 : i32
    %c2_i32_84 = arith.constant 2 : i32
    %211 = arith.muli %c2_i32_84, %arg0 : i32
    %c1_i32_85 = arith.constant 1 : i32
    %212 = arith.subi %c1_i32_85, %211 : i32
    %213 = arith.muli %212, %c5_i32 : i32
    %214 = arith.addi %210, %213 : i32
    %c0_86 = arith.constant 0 : index
    %215 = arith.index_cast %214 : i32 to index
    %c0_87 = arith.constant 0 : index
    %c0_88 = arith.constant 0 : index
    %216 = vector.load %arg2[%c0_86, %215, %c0_87, %c0_88] : memref<1x8x2x128xf32, #tpu.memory_space<vmem>>, vector<1x1x2x128xf32>
    %217 = vector.shape_cast %216 : vector<1x1x2x128xf32> to vector<2x128xf32>
    %c0_89 = arith.constant 0 : index
    %c0_90 = arith.constant 0 : index
    %c0_91 = arith.constant 0 : index
    %218 = vector.load %arg3[%c0_89, %c0_90, %c0_91] : memref<1x32x128xf32, #tpu.memory_space<vmem>>, vector<1x32x128xf32>
    %219 = vector.shape_cast %218 : vector<1x32x128xf32> to vector<32x128xf32>
    %cst_92 = arith.constant dense<0.000000e+00> : vector<2x128xf32>
    %220 = tpu.matmul %205, %219, %cst_92 {dimension_numbers = #tpu.dot_dimension_numbers<[1], [0], [0], [1], [0, 0, 1, 1], [], []>} : vector<2x32xf32>, vector<32x128xf32>, vector<2x128xf32> -> vector<2x128xf32>
    %221 = arith.addf %217, %220 : vector<2x128xf32>
    %222 = vector.extract_strided_slice %221 {offsets = [0, 0], sizes = [2, 32], strides = [1, 1]} : vector<2x128xf32> to vector<2x32xf32>
    %223 = arith.negf %222 : vector<2x32xf32>
    %224 = math.exp %223 : vector<2x32xf32>
    %cst_93 = arith.constant 1.000000e+00 : f32
    %225 = vector.broadcast %cst_93 : f32 to vector<2x32xf32>
    %226 = arith.addf %225, %224 : vector<2x32xf32>
    %227 = arith.divf %225, %226 : vector<2x32xf32>
    %228 = vector.extract_strided_slice %221 {offsets = [0, 32], sizes = [2, 32], strides = [1, 1]} : vector<2x128xf32> to vector<2x32xf32>
    %229 = arith.negf %228 : vector<2x32xf32>
    %230 = math.exp %229 : vector<2x32xf32>
    %cst_94 = arith.constant 1.000000e+00 : f32
    %231 = vector.broadcast %cst_94 : f32 to vector<2x32xf32>
    %232 = arith.addf %231, %230 : vector<2x32xf32>
    %233 = arith.divf %231, %232 : vector<2x32xf32>
    %234 = vector.extract_strided_slice %221 {offsets = [0, 64], sizes = [2, 32], strides = [1, 1]} : vector<2x128xf32> to vector<2x32xf32>
    %235 = math.tanh %234 : vector<2x32xf32>
    %236 = vector.extract_strided_slice %221 {offsets = [0, 96], sizes = [2, 32], strides = [1, 1]} : vector<2x128xf32> to vector<2x32xf32>
    %237 = arith.negf %236 : vector<2x32xf32>
    %238 = math.exp %237 : vector<2x32xf32>
    %cst_95 = arith.constant 1.000000e+00 : f32
    %239 = vector.broadcast %cst_95 : f32 to vector<2x32xf32>
    %240 = arith.addf %239, %238 : vector<2x32xf32>
    %241 = arith.divf %239, %240 : vector<2x32xf32>
    %242 = arith.mulf %233, %203 : vector<2x32xf32>
    %243 = arith.mulf %227, %235 : vector<2x32xf32>
    %244 = arith.addf %242, %243 : vector<2x32xf32>
    %245 = math.tanh %244 : vector<2x32xf32>
    %246 = arith.mulf %241, %245 : vector<2x32xf32>
    %c0_96 = arith.constant 0 : index
    %247 = arith.index_cast %214 : i32 to index
    %c0_97 = arith.constant 0 : index
    %c0_98 = arith.constant 0 : index
    %248 = vector.load %arg4[%c0_96, %247, %c0_97, %c0_98] : memref<1x8x2x32xf32, #tpu.memory_space<vmem>>, vector<1x1x2x32xf32>
    %249 = vector.shape_cast %248 : vector<1x1x2x32xf32> to vector<2x32xf32>
    %250 = vector.shape_cast %246 : vector<2x32xf32> to vector<1x1x2x32xf32>
    tpu.vector_store %arg4[%c0_96, %247, %c0_97, %c0_98], %250 {strides = array<i32>} : memref<1x8x2x32xf32, #tpu.memory_space<vmem>>, vector<1x1x2x32xf32>,
    %c6_i32 = arith.constant 6 : i32
    %c7_i32_99 = arith.constant 7 : i32
    %251 = arith.muli %arg0, %c7_i32_99 : i32
    %c2_i32_100 = arith.constant 2 : i32
    %252 = arith.muli %c2_i32_100, %arg0 : i32
    %c1_i32_101 = arith.constant 1 : i32
    %253 = arith.subi %c1_i32_101, %252 : i32
    %254 = arith.muli %253, %c6_i32 : i32
    %255 = arith.addi %251, %254 : i32
    %c0_102 = arith.constant 0 : index
    %256 = arith.index_cast %255 : i32 to index
    %c0_103 = arith.constant 0 : index
    %c0_104 = arith.constant 0 : index
    %257 = vector.load %arg2[%c0_102, %256, %c0_103, %c0_104] : memref<1x8x2x128xf32, #tpu.memory_space<vmem>>, vector<1x1x2x128xf32>
    %258 = vector.shape_cast %257 : vector<1x1x2x128xf32> to vector<2x128xf32>
    %c0_105 = arith.constant 0 : index
    %c0_106 = arith.constant 0 : index
    %c0_107 = arith.constant 0 : index
    %259 = vector.load %arg3[%c0_105, %c0_106, %c0_107] : memref<1x32x128xf32, #tpu.memory_space<vmem>>, vector<1x32x128xf32>
    %260 = vector.shape_cast %259 : vector<1x32x128xf32> to vector<32x128xf32>
    %cst_108 = arith.constant dense<0.000000e+00> : vector<2x128xf32>
    %261 = tpu.matmul %246, %260, %cst_108 {dimension_numbers = #tpu.dot_dimension_numbers<[1], [0], [0], [1], [0, 0, 1, 1], [], []>} : vector<2x32xf32>, vector<32x128xf32>, vector<2x128xf32> -> vector<2x128xf32>
    %262 = arith.addf %258, %261 : vector<2x128xf32>
    %263 = vector.extract_strided_slice %262 {offsets = [0, 0], sizes = [2, 32], strides = [1, 1]} : vector<2x128xf32> to vector<2x32xf32>
    %264 = arith.negf %263 : vector<2x32xf32>
    %265 = math.exp %264 : vector<2x32xf32>
    %cst_109 = arith.constant 1.000000e+00 : f32
    %266 = vector.broadcast %cst_109 : f32 to vector<2x32xf32>
    %267 = arith.addf %266, %265 : vector<2x32xf32>
    %268 = arith.divf %266, %267 : vector<2x32xf32>
    %269 = vector.extract_strided_slice %262 {offsets = [0, 32], sizes = [2, 32], strides = [1, 1]} : vector<2x128xf32> to vector<2x32xf32>
    %270 = arith.negf %269 : vector<2x32xf32>
    %271 = math.exp %270 : vector<2x32xf32>
    %cst_110 = arith.constant 1.000000e+00 : f32
    %272 = vector.broadcast %cst_110 : f32 to vector<2x32xf32>
    %273 = arith.addf %272, %271 : vector<2x32xf32>
    %274 = arith.divf %272, %273 : vector<2x32xf32>
    %275 = vector.extract_strided_slice %262 {offsets = [0, 64], sizes = [2, 32], strides = [1, 1]} : vector<2x128xf32> to vector<2x32xf32>
    %276 = math.tanh %275 : vector<2x32xf32>
    %277 = vector.extract_strided_slice %262 {offsets = [0, 96], sizes = [2, 32], strides = [1, 1]} : vector<2x128xf32> to vector<2x32xf32>
    %278 = arith.negf %277 : vector<2x32xf32>
    %279 = math.exp %278 : vector<2x32xf32>
    %cst_111 = arith.constant 1.000000e+00 : f32
    %280 = vector.broadcast %cst_111 : f32 to vector<2x32xf32>
    %281 = arith.addf %280, %279 : vector<2x32xf32>
    %282 = arith.divf %280, %281 : vector<2x32xf32>
    %283 = arith.mulf %274, %244 : vector<2x32xf32>
    %284 = arith.mulf %268, %276 : vector<2x32xf32>
    %285 = arith.addf %283, %284 : vector<2x32xf32>
    %286 = math.tanh %285 : vector<2x32xf32>
    %287 = arith.mulf %282, %286 : vector<2x32xf32>
    %c0_112 = arith.constant 0 : index
    %288 = arith.index_cast %255 : i32 to index
    %c0_113 = arith.constant 0 : index
    %c0_114 = arith.constant 0 : index
    %289 = vector.load %arg4[%c0_112, %288, %c0_113, %c0_114] : memref<1x8x2x32xf32, #tpu.memory_space<vmem>>, vector<1x1x2x32xf32>
    %290 = vector.shape_cast %289 : vector<1x1x2x32xf32> to vector<2x32xf32>
    %291 = vector.shape_cast %287 : vector<2x32xf32> to vector<1x1x2x32xf32>
    tpu.vector_store %arg4[%c0_112, %288, %c0_113, %c0_114], %291 {strides = array<i32>} : memref<1x8x2x32xf32, #tpu.memory_space<vmem>>, vector<1x1x2x32xf32>,
    %c7_i32_115 = arith.constant 7 : i32
    %c7_i32_116 = arith.constant 7 : i32
    %292 = arith.muli %arg0, %c7_i32_116 : i32
    %c2_i32_117 = arith.constant 2 : i32
    %293 = arith.muli %c2_i32_117, %arg0 : i32
    %c1_i32_118 = arith.constant 1 : i32
    %294 = arith.subi %c1_i32_118, %293 : i32
    %295 = arith.muli %294, %c7_i32_115 : i32
    %296 = arith.addi %292, %295 : i32
    %c0_119 = arith.constant 0 : index
    %297 = arith.index_cast %296 : i32 to index
    %c0_120 = arith.constant 0 : index
    %c0_121 = arith.constant 0 : index
    %298 = vector.load %arg2[%c0_119, %297, %c0_120, %c0_121] : memref<1x8x2x128xf32, #tpu.memory_space<vmem>>, vector<1x1x2x128xf32>
    %299 = vector.shape_cast %298 : vector<1x1x2x128xf32> to vector<2x128xf32>
    %c0_122 = arith.constant 0 : index
    %c0_123 = arith.constant 0 : index
    %c0_124 = arith.constant 0 : index
    %300 = vector.load %arg3[%c0_122, %c0_123, %c0_124] : memref<1x32x128xf32, #tpu.memory_space<vmem>>, vector<1x32x128xf32>
    %301 = vector.shape_cast %300 : vector<1x32x128xf32> to vector<32x128xf32>
    %cst_125 = arith.constant dense<0.000000e+00> : vector<2x128xf32>
    %302 = tpu.matmul %287, %301, %cst_125 {dimension_numbers = #tpu.dot_dimension_numbers<[1], [0], [0], [1], [0, 0, 1, 1], [], []>} : vector<2x32xf32>, vector<32x128xf32>, vector<2x128xf32> -> vector<2x128xf32>
    %303 = arith.addf %299, %302 : vector<2x128xf32>
    %304 = vector.extract_strided_slice %303 {offsets = [0, 0], sizes = [2, 32], strides = [1, 1]} : vector<2x128xf32> to vector<2x32xf32>
    %305 = arith.negf %304 : vector<2x32xf32>
    %306 = math.exp %305 : vector<2x32xf32>
    %cst_126 = arith.constant 1.000000e+00 : f32
    %307 = vector.broadcast %cst_126 : f32 to vector<2x32xf32>
    %308 = arith.addf %307, %306 : vector<2x32xf32>
    %309 = arith.divf %307, %308 : vector<2x32xf32>
    %310 = vector.extract_strided_slice %303 {offsets = [0, 32], sizes = [2, 32], strides = [1, 1]} : vector<2x128xf32> to vector<2x32xf32>
    %311 = arith.negf %310 : vector<2x32xf32>
    %312 = math.exp %311 : vector<2x32xf32>
    %cst_127 = arith.constant 1.000000e+00 : f32
    %313 = vector.broadcast %cst_127 : f32 to vector<2x32xf32>
    %314 = arith.addf %313, %312 : vector<2x32xf32>
    %315 = arith.divf %313, %314 : vector<2x32xf32>
    %316 = vector.extract_strided_slice %303 {offsets = [0, 64], sizes = [2, 32], strides = [1, 1]} : vector<2x128xf32> to vector<2x32xf32>
    %317 = math.tanh %316 : vector<2x32xf32>
    %318 = vector.extract_strided_slice %303 {offsets = [0, 96], sizes = [2, 32], strides = [1, 1]} : vector<2x128xf32> to vector<2x32xf32>
    %319 = arith.negf %318 : vector<2x32xf32>
    %320 = math.exp %319 : vector<2x32xf32>
    %cst_128 = arith.constant 1.000000e+00 : f32
    %321 = vector.broadcast %cst_128 : f32 to vector<2x32xf32>
    %322 = arith.addf %321, %320 : vector<2x32xf32>
    %323 = arith.divf %321, %322 : vector<2x32xf32>
    %324 = arith.mulf %315, %285 : vector<2x32xf32>
    %325 = arith.mulf %309, %317 : vector<2x32xf32>
    %326 = arith.addf %324, %325 : vector<2x32xf32>
    %327 = math.tanh %326 : vector<2x32xf32>
    %328 = arith.mulf %323, %327 : vector<2x32xf32>
    %c0_129 = arith.constant 0 : index
    %329 = arith.index_cast %296 : i32 to index
    %c0_130 = arith.constant 0 : index
    %c0_131 = arith.constant 0 : index
    %330 = vector.load %arg4[%c0_129, %329, %c0_130, %c0_131] : memref<1x8x2x32xf32, #tpu.memory_space<vmem>>, vector<1x1x2x32xf32>
    %331 = vector.shape_cast %330 : vector<1x1x2x32xf32> to vector<2x32xf32>
    %332 = vector.shape_cast %328 : vector<2x32xf32> to vector<1x1x2x32xf32>
    tpu.vector_store %arg4[%c0_129, %329, %c0_130, %c0_131], %332 {strides = array<i32>} : memref<1x8x2x32xf32, #tpu.memory_space<vmem>>, vector<1x1x2x32xf32>,
    %c8_i32 = arith.constant 8 : i32
    %c0_132 = arith.constant 0 : index
    %c0_133 = arith.constant 0 : index
    %333 = vector.load %arg5[%c0_132, %c0_133] : memref<2x32xf32, #tpu.memory_space<vmem>>, vector<2x32xf32>
    tpu.vector_store %arg5[%c0_132, %c0_133], %328 {strides = array<i32>} : memref<2x32xf32, #tpu.memory_space<vmem>>, vector<2x32xf32>,
    %c0_134 = arith.constant 0 : index
    %c0_135 = arith.constant 0 : index
    %334 = vector.load %arg6[%c0_134, %c0_135] : memref<2x32xf32, #tpu.memory_space<vmem>>, vector<2x32xf32>
    tpu.vector_store %arg6[%c0_134, %c0_135], %326 {strides = array<i32>} : memref<2x32xf32, #tpu.memory_space<vmem>>, vector<2x32xf32>,
    return
  }
  func.func @transform_0(%arg0: i32, %arg1: i32) -> (i32, i32, i32, i32) {
    %c0_i32 = arith.constant 0 : i32
    %0 = arith.muli %arg0, %c0_i32 : i32
    %c2_i32 = arith.constant 2 : i32
    %1 = arith.muli %c2_i32, %arg0 : i32
    %c1_i32 = arith.constant 1 : i32
    %2 = arith.subi %c1_i32, %1 : i32
    %3 = arith.muli %2, %arg1 : i32
    %4 = arith.addi %0, %3 : i32
    %c0_i32_0 = arith.constant 0 : i32
    %c0_i32_1 = arith.constant 0 : i32
    %c0_i32_2 = arith.constant 0 : i32
    return %arg0, %4, %c0_i32_0, %c0_i32_1 : i32, i32, i32, i32
  }
  func.func @transform_1(%arg0: i32, %arg1: i32) -> (i32, i32, i32) {
    %c0_i32 = arith.constant 0 : i32
    %c0_i32_0 = arith.constant 0 : i32
    %c0_i32_1 = arith.constant 0 : i32
    return %arg0, %c0_i32, %c0_i32_0 : i32, i32, i32
  }
  func.func @transform_2(%arg0: i32, %arg1: i32) -> (i32, i32, i32, i32) {
    %c0_i32 = arith.constant 0 : i32
    %0 = arith.muli %arg0, %c0_i32 : i32
    %c2_i32 = arith.constant 2 : i32
    %1 = arith.muli %c2_i32, %arg0 : i32
    %c1_i32 = arith.constant 1 : i32
    %2 = arith.subi %c1_i32, %1 : i32
    %3 = arith.muli %2, %arg1 : i32
    %4 = arith.addi %0, %3 : i32
    %c0_i32_0 = arith.constant 0 : i32
    %c0_i32_1 = arith.constant 0 : i32
    %c0_i32_2 = arith.constant 0 : i32
    return %arg0, %4, %c0_i32_0, %c0_i32_1 : i32, i32, i32, i32
  }
}

</mosaic_0001>

<bundles_post_ra>
// kernel: bilstm_forward.1
= control target key start
LH: loop header
LB: loop body
LE: loop exit
PB: predicated region body
PF: predicated region fallthrough
CT: control target
= control target key end

     0   :  { %s1701_s9 = smov 0   ;;  %s1703_s10 = smov 0   ;;  %s1927_s0 = inlined_call_operand.vmem [shape: f32[2,8,2,128], index: 0, kind: input, shape index: {}]   ;;  %s1928_s1 = inlined_call_operand.vmem [shape: f32[2,32,128], index: 1, kind: input, shape index: {}]   ;;  %s1929_s2 = inlined_call_operand.vmem [shape: f32[2,8,2,32], index: 2, kind: output, shape index: {}]  }
   0x1   :  { %s1705_s11 = smov 0  }
   0x2 LB: > { %s24_s12 = sadd.s32 1, %s1674_s10  ;;  %p1345_p0 = scmp.ge.s32.totalorder %s1678_s11, 1  ;;  %s1678_s11 = sphi %s1705_s11, %s12_s11   ;;  %s1674_s10 = sphi %s1703_s10, %s1931_s10   ;;  %s1670_s9 = sphi %s1701_s9, %s1930_s9  }
   0x3   : > { %p26_p1 = scmp.ge.s32.totalorder %s24_s12, 2  ;;  %p161_p2 = scmp.lt.s32.totalorder %s1678_s11, 3 }
   0x5   : > { %s1933_s12 = smov (%p26_p1, %s24_s12), 0  ;;  %p162_p3 = pnand %p1345_p0, %p161_p2 }
   0x6   : > { %p206_p4 = scmp.lt.s32.totalorder (!%p162_p3), %s1670_s9, 1  ;;  %vm243_vm0 = vcmask (!%p162_p3), 254976   ;;  %v1680_v0 = vmov (!%p162_p3), 0.0|0.0   ;;  %vm1681_vm1 = vmmov (!%p162_p3), 0   ;;  %v1682_v1 = vmov (!%p162_p3), 0.0   ;;  %s1354_s19 = smul.u32 (!%p162_p3), 14, %s1670_s9 }
   0x7   : > { %165 = sbr.rel (%p162_p3) target bundleno = 5645 (0x160d), region = 28  ;;  %1514 = vmatprep.subr.bf16.mxu0 (!%p162_p3), %v1680_v0  ;;  %1434 = vmatprep.mubr.msk.f32.mxu0 (!%p162_p3), %vm1681_vm1, %v1682_v1  ;;  %244 = vst.msk [vmem:[#allocation2] sm:$0x3] (!%p162_p3), %vm243_vm0, %v1682_v1  ;;  %245 = vst.msk [vmem:[#allocation3] sm:$0x3] (!%p162_p3), %vm243_vm0, %v1682_v1  ;;  %vm256_vm2 = vcmask (!%p162_p3), 261120  }
   0x8   : > { %1520 = vmatprep.subr.bf16.mxu1 (!%p162_p3), %v1680_v0  ;;  %1445 = vmatprep.mubr.msk.f32.mxu1 (!%p162_p3), %vm1681_vm1, %v1682_v1  ;;  %s1683_s24 = smov (!%p162_p3), 64   ;;  %s1684_s25 = smov (!%p162_p3), 32  }
   0x9   : > { %s1357_s30 = sshll.u32 (!%p162_p3), %s1670_s9, 1  ;;  %s1795_s3 = smul.u32 (!%p162_p3), 7, %s1670_s9 }
   0xa   : > { %s1797_s4 = ssub.s32 (!%p162_p3), 1, %s1357_s30 }
   0xb   : > { %s368_s5 = sadd.s32 (!%p162_p3), %s1797_s4, %s1795_s3 }
   0xc   : > { %s1801_s6 = sshll.u32 (!%p162_p3), %s368_s5, 1  ;;  %s815_s5 = smul.u32 (!%p162_p3), 5, %s1797_s4 }
   0xe   : > { %s1730_s13 = scalar_select %p206_p4, %s1670_s9, 1  ;;  %v246_v8 = vld [vmem:[#allocation2] sm:$0x3]  ;;  %v247_v14 = vld [vmem:[#allocation3] sm:$0x3] }
   0xf   : > { %s1361_s9 = sshll.u32 %s1797_s4, 1 }
  0x10   : > { %s1384_s14 = sshll.u32 %s1730_s13, 5  ;;  %s1383_s18 = sshll.u32 %s1730_s13, 4 }
  0x11   : > { %s222_s17 = scalar_lea.vmem %s1928_s1, %s1384_s14  ;;  %s1765_s22 = scalar_lea.vmem %s1927_s0, %s1383_s18 }
  0x12   : > { %v252_v2 = vld [vmem:[%s222_s17] sm:$0xff]  ;;  %v253_v3 = vld [vmem:[%s222_s17 + $0x8] sm:$0xff]  ;;  %v254_v4 = vld [vmem:[%s222_s17 + $0x10] sm:$0xff]  ;;  %s250_s23 = scalar_lea.vmem %s1765_s22, %s1354_s19  ;;  %s1780_s28 = scalar_lea.vmem %s1929_s2, %s1383_s18 }
  0x13   : > { %v1739_v5 = vpack.c.bf16 %v253_v3, %v252_v2  ;;  %v255_v6 = vld [vmem:[%s222_s17 + $0x18] sm:$0xff]  ;;  %v251_v9 = vld [vmem:[%s250_s23] sm:$0x3]  ;;  %s363_s29 = scalar_lea.vmem %s1780_s28, %s1354_s19  ;;  %s370_s7 = scalar_lea.vmem %s1765_s22, %s1801_s6 }
  0x14   : > { %v1742_v7 = vpack.c.bf16 %v255_v6, %v254_v4  ;;  %v371_v29 = vld [vmem:[%s370_s7] sm:$0x3]  ;;  %s477_s8 = scalar_lea.vmem %s1780_s28, %s1801_s6  ;;  %s1821_s13 = sadd.s32 %s1361_s9, %s1795_s3 }
  0x15   : > { %1516 = vmatpush3.bf16.msra.mxu0 %v1739_v5  ;;  %1522 = vmatpush3.bf16.msra.mxu1 %v1739_v5  ;;  %s1362_s14 = sshll.u32 %s1821_s13, 1  ;;  %s591_s17 = smul.u32 3, %s1797_s4 }
  0x16   : > { %1517 = vmatprep.subr.bf16.mxu0 %v1680_v0  ;;  %1523 = vmatprep.subr.bf16.mxu1 %v1680_v0  ;;  %s482_s15 = scalar_lea.vmem %s1765_s22, %s1362_s14  ;;  %s589_s16 = scalar_lea.vmem %s1780_s28, %s1362_s14 }
  0x17   : > { %v483_v47 = vld [vmem:[%s482_s15] sm:$0x3]  ;;  %s1840_s18 = sadd.s32 %s591_s17, %s1795_s3  ;;  %s1368_s23 = sshll.u32 %s1797_s4, 2 }
  0x18   : > { %s1365_s19 = sshll.u32 %s1840_s18, 1  ;;  %s1858_s26 = sadd.s32 %s1368_s23, %s1795_s3 }
  0x19   : > { %1519 = vmatpush3.bf16.msra.mxu0 %v1742_v7  ;;  %1525 = vmatpush3.bf16.msra.mxu1 %v1742_v7  ;;  %s594_s20 = scalar_lea.vmem %s1765_s22, %s1365_s19  ;;  %s701_s21 = scalar_lea.vmem %s1780_s28, %s1365_s19 }
  0x1a   : > { %1526 = vmatprep.subr.bf16.mxu0 %v1680_v0  ;;  %1532 = vmatprep.subr.bf16.mxu1 %v1680_v0  ;;  %v595_v3 = vld [vmem:[%s594_s20] sm:$0x3]  ;;  %s1369_s27 = sshll.u32 %s1858_s26, 1  ;;  %s1876_s6 = sadd.s32 %s815_s5, %s1795_s3 }
  0x1b   : > { %s813_s30 = scalar_lea.vmem %s1780_s28, %s1369_s27  ;;  %s1372_s7 = sshll.u32 %s1876_s6, 1 }
  0x1c   : > { %1435 = vmatmul.mubr.msk.f32.vlgmr.msra.gmra.mrb[0].mxu0 %vm256_vm2, %v246_v8  ;;  %s925_s9 = scalar_lea.vmem %s1780_s28, %s1372_s7  ;;  %s927_s13 = smul.u32 6, %s1797_s4 }
  0x1d   : > { %1528 = vmatpush3.bf16.msra.mxu0 %v1739_v5  ;;  %1456 = vmatprep.mubr.msk.f32.mxu0 %vm1681_vm1, %v1682_v1  ;;  %s1039_s18 = smul.u32 7, %s1797_s4 }
  0x1e   : > { %1529 = vmatprep.subr.bf16.mxu0 %v1680_v0  ;;  %s1889_s14 = sadd.s32 %s927_s13, %s1795_s3 }
  0x1f   : > { %s1375_s15 = sshll.u32 %s1889_s14, 1  ;;  %s1902_s19 = sadd.s32 %s1039_s18, %s1795_s3 }
  0x20   : > { %s1037_s17 = scalar_lea.vmem %s1780_s28, %s1375_s15  ;;  %s1378_s20 = sshll.u32 %s1902_s19, 1 }
  0x21   : > { %1531 = vmatpush3.bf16.msra.mxu0 %v1742_v7  ;;  %s1149_s3 = scalar_lea.vmem %s1780_s28, %s1378_s20 }
  0x22   : > { %1538 = vmatprep.subr.bf16.mxu0 %v1680_v0 }
  0xef   : > { %v326_v10 = vpop.f32.mrb[0].mxu0 }
  0xf0   : > { %v330_v11 = vadd.f32 %v326_v10, %v251_v9  ;;  %v1436_v12 = vpop.f32.mrb[1].mxu0 }
  0xf2   : > { %1592 = vtanh.f32 %v330_v11  ;;  %v1356_v15 = vmul.f32 -1.442695, %v330_v11 }
  0xf4   : > { %1594 = vpow2.f32 %v1356_v15 }
  0xfc   : > { %v1593_v13 = vpop.eup %1592 }
  0xfd   : > { %344 = vrot.lane.b32.xlu0 %v1593_v13, %s1683_s24 }
  0xfe   : > { %v1595_v16 = vpop.eup %1594 }
  0xff   : > { %v334_v17 = vadd.f32 1.0, %v1595_v16 }
 0x101   : > { %339 = vrot.lane.b32.xlu0 %v247_v14, %s1684_s25  ;;  %1596 = vrcp.f32 %v334_v17 }
 0x10b   : > { %v1597_v18 = vpop.eup %1596 }
 0x16f   : > { %v345_v19 = vpop.permute.xlu0 %344 }
 0x170   : > { %v347_v20 = vmul.f32 %v1597_v18, %v345_v19 }
 0x172   : > { %349 = vrot.lane.b32.xlu1 %v347_v20, %s1684_s25 }
 0x173   : > { %v340_v21 = vpop.permute.xlu0 %339 }
 0x174   : > { %v342_v22 = vmul.f32 %v1597_v18, %v340_v21 }
 0x1e4   : > { %v350_v23 = vpop.permute.xlu1 %349 }
 0x1e5   : > { %v352_v24 = vadd.f32 %v350_v23, %v342_v22 }
 0x1e7   : > { %1598 = vtanh.f32 %v352_v24 }
 0x1f1   : > { %v1599_v25 = vpop.eup %1598 }
 0x1f2   : > { %355 = vrot.lane.b32.xlu1 %v1599_v25, %s1683_s24 }
 0x264   : > { %v356_v26 = vpop.permute.xlu1 %355 }
 0x265   : > { %v358_v27 = vmul.f32 %v1597_v18, %v356_v26 }
 0x267   : > { %360 = vrot.lane.b32.xlu0 %v358_v27, %s1684_s25 }
 0x2d9   : > { %v361_v28 = vpop.permute.xlu0 %360 }
 0x2da   : > { %365 = vst.msk [vmem:[%s363_s29] sm:$0x3] %vm243_vm0, %v361_v28  ;;  %1446 = vmatmul.mubr.msk.f32.vlgmr.msra.gmra.mrb[0].mxu1 %vm256_vm2, %v361_v28  ;;  %s706_s29 = scalar_lea.vmem %s1765_s22, %s1369_s27 }
 0x2db   : > { %1534 = vmatpush3.bf16.msra.mxu1 %v1739_v5  ;;  %1467 = vmatprep.mubr.msk.f32.mxu1 %vm1681_vm1, %v1682_v1  ;;  %v707_v23 = vld [vmem:[%s706_s29] sm:$0x3] }
 0x2dc   : > { %1535 = vmatprep.subr.bf16.mxu1 %v1680_v0 }
 0x2df   : > { %1537 = vmatpush3.bf16.msra.mxu1 %v1742_v7 }
 0x2e0   : > { %1544 = vmatprep.subr.bf16.mxu1 %v1680_v0 }
 0x3ad   : > { %v444_v30 = vpop.f32.mrb[0].mxu1 }
 0x3ae   : > { %v448_v31 = vadd.f32 %v444_v30, %v371_v29  ;;  %v1447_v32 = vpop.f32.mrb[1].mxu1 }
 0x3b0   : > { %1600 = vtanh.f32 %v448_v31  ;;  %v1360_v34 = vmul.f32 -1.442695, %v448_v31 }
 0x3b2   : > { %1602 = vpow2.f32 %v1360_v34 }
 0x3ba   : > { %v1601_v33 = vpop.eup %1600 }
 0x3bb   : > { %458 = vrot.lane.b32.xlu1 %v1601_v33, %s1683_s24 }
 0x3bc   : > { %v1603_v35 = vpop.eup %1602 }
 0x3bd   : > { %v452_v36 = vadd.f32 1.0, %v1603_v35 }
 0x3bf   : > { %1604 = vrcp.f32 %v452_v36 }
 0x3c9   : > { %v1605_v37 = vpop.eup %1604 }
 0x3ca   : > { %v456_v40 = vmul.f32 %v1605_v37, %v352_v24 }
 0x42d   : > { %v459_v38 = vpop.permute.xlu1 %458 }
 0x42e   : > { %v461_v39 = vmul.f32 %v1605_v37, %v459_v38 }
 0x430   : > { %463 = vrot.lane.b32.xlu0 %v461_v39, %s1684_s25 }
 0x4a2   : > { %v464_v41 = vpop.permute.xlu0 %463 }
 0x4a3   : > { %v466_v42 = vadd.f32 %v464_v41, %v456_v40 }
 0x4a5   : > { %1606 = vtanh.f32 %v466_v42 }
 0x4af   : > { %v1607_v43 = vpop.eup %1606 }
 0x4b0   : > { %469 = vrot.lane.b32.xlu1 %v1607_v43, %s1683_s24 }
 0x522   : > { %v470_v44 = vpop.permute.xlu1 %469 }
 0x523   : > { %v472_v45 = vmul.f32 %v1605_v37, %v470_v44 }
 0x525   : > { %474 = vrot.lane.b32.xlu0 %v472_v45, %s1684_s25 }
 0x597   : > { %v475_v46 = vpop.permute.xlu0 %474 }
 0x598   : > { %478 = vst.msk [vmem:[%s477_s8] sm:$0x3] %vm243_vm0, %v475_v46  ;;  %1457 = vmatmul.mubr.msk.f32.vlgmr.msra.gmra.mrb[2].mxu0 %vm256_vm2, %v475_v46  ;;  %s818_s8 = scalar_lea.vmem %s1765_s22, %s1372_s7 }
 0x599   : > { %1540 = vmatpush3.bf16.msra.mxu0 %v1739_v5  ;;  %1478 = vmatprep.mubr.msk.f32.mxu0 %vm1681_vm1, %v1682_v1  ;;  %v819_v41 = vld [vmem:[%s818_s8] sm:$0x3] }
 0x59a   : > { %1541 = vmatprep.subr.bf16.mxu0 %v1680_v0 }
 0x59d   : > { %1543 = vmatpush3.bf16.msra.mxu0 %v1742_v7 }
 0x59e   : > { %1550 = vmatprep.subr.bf16.mxu0 %v1680_v0 }
 0x66b   : > { %v556_v48 = vpop.f32.mrb[2].mxu0 }
 0x66c   : > { %v560_v49 = vadd.f32 %v556_v48, %v483_v47  ;;  %v1458_v50 = vpop.f32.mrb[3].mxu0 }
 0x66e   : > { %1608 = vtanh.f32 %v560_v49  ;;  %v1364_v52 = vmul.f32 -1.442695, %v560_v49 }
 0x670   : > { %1610 = vpow2.f32 %v1364_v52 }
 0x678   : > { %v1609_v51 = vpop.eup %1608 }
 0x679   : > { %570 = vrot.lane.b32.xlu1 %v1609_v51, %s1683_s24 }
 0x67a   : > { %v1611_v53 = vpop.eup %1610 }
 0x67b   : > { %v564_v54 = vadd.f32 1.0, %v1611_v53 }
 0x67d   : > { %1612 = vrcp.f32 %v564_v54 }
 0x687   : > { %v1613_v55 = vpop.eup %1612 }
 0x688   : > { %v568_v58 = vmul.f32 %v1613_v55, %v466_v42 }
 0x6eb   : > { %v571_v56 = vpop.permute.xlu1 %570 }
 0x6ec   : > { %v573_v57 = vmul.f32 %v1613_v55, %v571_v56 }
 0x6ee   : > { %575 = vrot.lane.b32.xlu0 %v573_v57, %s1684_s25 }
 0x760   : > { %v576_v59 = vpop.permute.xlu0 %575 }
 0x761   : > { %v578_v60 = vadd.f32 %v576_v59, %v568_v58 }
 0x763   : > { %1614 = vtanh.f32 %v578_v60 }
 0x76d   : > { %v1615_v61 = vpop.eup %1614 }
 0x76e   : > { %581 = vrot.lane.b32.xlu1 %v1615_v61, %s1683_s24 }
 0x7e0   : > { %v582_v62 = vpop.permute.xlu1 %581 }
 0x7e1   : > { %v584_v63 = vmul.f32 %v1613_v55, %v582_v62 }
 0x7e3   : > { %586 = vrot.lane.b32.xlu0 %v584_v63, %s1684_s25 }
 0x855   : > { %v587_v2 = vpop.permute.xlu0 %586 }
 0x856   : > { %590 = vst.msk [vmem:[%s589_s16] sm:$0x3] %vm243_vm0, %v587_v2  ;;  %1468 = vmatmul.mubr.msk.f32.vlgmr.msra.gmra.mrb[2].mxu1 %vm256_vm2, %v587_v2  ;;  %s930_s16 = scalar_lea.vmem %s1765_s22, %s1375_s15 }
 0x857   : > { %1546 = vmatpush3.bf16.msra.mxu1 %v1739_v5  ;;  %1489 = vmatprep.mubr.msk.f32.mxu1 %vm1681_vm1, %v1682_v1  ;;  %v931_v55 = vld [vmem:[%s930_s16] sm:$0x3] }
 0x858   : > { %1547 = vmatprep.subr.bf16.mxu1 %v1680_v0 }
 0x85b   : > { %1549 = vmatpush3.bf16.msra.mxu1 %v1742_v7 }
 0x85c   : > { %1556 = vmatprep.subr.bf16.mxu1 %v1680_v0 }
 0x929   : > { %v668_v4 = vpop.f32.mrb[2].mxu1 }
 0x92a   : > { %v672_v6 = vadd.f32 %v668_v4, %v595_v3  ;;  %v1469_v8 = vpop.f32.mrb[3].mxu1 }
 0x92c   : > { %1616 = vtanh.f32 %v672_v6  ;;  %v1367_v10 = vmul.f32 -1.442695, %v672_v6 }
 0x92e   : > { %1618 = vpow2.f32 %v1367_v10 }
 0x936   : > { %v1617_v9 = vpop.eup %1616 }
 0x937   : > { %682 = vrot.lane.b32.xlu1 %v1617_v9, %s1683_s24 }
 0x938   : > { %v1619_v11 = vpop.eup %1618 }
 0x939   : > { %v676_v12 = vadd.f32 1.0, %v1619_v11 }
 0x93b   : > { %1620 = vrcp.f32 %v676_v12 }
 0x945   : > { %v1621_v13 = vpop.eup %1620 }
 0x946   : > { %v680_v16 = vmul.f32 %v1621_v13, %v578_v60 }
 0x9a9   : > { %v683_v14 = vpop.permute.xlu1 %682 }
 0x9aa   : > { %v685_v15 = vmul.f32 %v1621_v13, %v683_v14 }
 0x9ac   : > { %687 = vrot.lane.b32.xlu0 %v685_v15, %s1684_s25 }
 0xa1e   : > { %v688_v17 = vpop.permute.xlu0 %687 }
 0xa1f   : > { %v690_v18 = vadd.f32 %v688_v17, %v680_v16 }
 0xa21   : > { %1622 = vtanh.f32 %v690_v18 }
 0xa2b   : > { %v1623_v19 = vpop.eup %1622 }
 0xa2c   : > { %693 = vrot.lane.b32.xlu1 %v1623_v19, %s1683_s24 }
 0xa9e   : > { %v694_v20 = vpop.permute.xlu1 %693 }
 0xa9f   : > { %v696_v21 = vmul.f32 %v1621_v13, %v694_v20 }
 0xaa1   : > { %698 = vrot.lane.b32.xlu0 %v696_v21, %s1684_s25 }
 0xb13   : > { %v699_v22 = vpop.permute.xlu0 %698 }
 0xb14   : > { %702 = vst.msk [vmem:[%s701_s21] sm:$0x3] %vm243_vm0, %v699_v22  ;;  %1479 = vmatmul.mubr.msk.f32.vlgmr.msra.gmra.mrb[4].mxu0 %vm256_vm2, %v699_v22  ;;  %s1042_s21 = scalar_lea.vmem %s1765_s22, %s1378_s20  ;;  %s1685_s22 = smov 96  }
 0xb15   : > { %1552 = vmatpush3.bf16.msra.mxu0 %v1739_v5  ;;  %1500 = vmatprep.mubr.msk.f32.mxu0 %vm1681_vm1, %v1682_v1  ;;  %v1043_v13 = vld [vmem:[%s1042_s21] sm:$0x3] }
 0xb16   : > { %1553 = vmatprep.subr.bf16.mxu0 %v1680_v0 }
 0xb19   : > { %1555 = vmatpush3.bf16.msra.mxu0 %v1742_v7 }
 0xbe7   : > { %v780_v24 = vpop.f32.mrb[4].mxu0 }
 0xbe8   : > { %v784_v25 = vadd.f32 %v780_v24, %v707_v23  ;;  %v1480_v26 = vpop.f32.mrb[5].mxu0 }
 0xbea   : > { %1624 = vtanh.f32 %v784_v25  ;;  %v1371_v28 = vmul.f32 -1.442695, %v784_v25 }
 0xbec   : > { %1626 = vpow2.f32 %v1371_v28 }
 0xbf4   : > { %v1625_v27 = vpop.eup %1624 }
 0xbf5   : > { %794 = vrot.lane.b32.xlu1 %v1625_v27, %s1683_s24 }
 0xbf6   : > { %v1627_v29 = vpop.eup %1626 }
 0xbf7   : > { %v788_v30 = vadd.f32 1.0, %v1627_v29 }
 0xbf9   : > { %1628 = vrcp.f32 %v788_v30 }
 0xc03   : > { %v1629_v31 = vpop.eup %1628 }
 0xc04   : > { %v792_v34 = vmul.f32 %v1629_v31, %v690_v18 }
 0xc67   : > { %v795_v32 = vpop.permute.xlu1 %794 }
 0xc68   : > { %v797_v33 = vmul.f32 %v1629_v31, %v795_v32 }
 0xc6a   : > { %799 = vrot.lane.b32.xlu0 %v797_v33, %s1684_s25 }
 0xcdc   : > { %v800_v35 = vpop.permute.xlu0 %799 }
 0xcdd   : > { %v802_v36 = vadd.f32 %v800_v35, %v792_v34 }
 0xcdf   : > { %1630 = vtanh.f32 %v802_v36 }
 0xce9   : > { %v1631_v37 = vpop.eup %1630 }
 0xcea   : > { %805 = vrot.lane.b32.xlu1 %v1631_v37, %s1683_s24 }
 0xd5c   : > { %v806_v38 = vpop.permute.xlu1 %805 }
 0xd5d   : > { %v808_v39 = vmul.f32 %v1629_v31, %v806_v38 }
 0xd5f   : > { %810 = vrot.lane.b32.xlu0 %v808_v39, %s1684_s25 }
 0xdd1   : > { %v811_v40 = vpop.permute.xlu0 %810 }
 0xdd2   : > { %814 = vst.msk [vmem:[%s813_s30] sm:$0x3] %vm243_vm0, %v811_v40  ;;  %1490 = vmatmul.mubr.msk.f32.vlgmr.msra.gmra.mrb[4].mxu1 %vm256_vm2, %v811_v40 }
 0xdd3   : > { %1558 = vmatpush3.bf16.msra.mxu1 %v1739_v5  ;;  %1511 = vmatprep.mubr.msk.f32.mxu1 %vm1681_vm1, %v1682_v1 }
 0xdd4   : > { %1559 = vmatprep.subr.bf16.mxu1 %v1680_v0 }
 0xdd7   : > { %1561 = vmatpush3.bf16.msra.mxu1 %v1742_v7 }
 0xea5   : > { %v892_v42 = vpop.f32.mrb[4].mxu1 }
 0xea6   : > { %v896_v43 = vadd.f32 %v892_v42, %v819_v41  ;;  %v1491_v44 = vpop.f32.mrb[5].mxu1 }
 0xea8   : > { %1632 = vtanh.f32 %v896_v43  ;;  %v1374_v5 = vmul.f32 -1.442695, %v896_v43 }
 0xeaa   : > { %1634 = vpow2.f32 %v1374_v5 }
 0xeb2   : > { %v1633_v45 = vpop.eup %1632 }
 0xeb3   : > { %906 = vrot.lane.b32.xlu1 %v1633_v45, %s1683_s24 }
 0xeb4   : > { %v1635_v1 = vpop.eup %1634 }
 0xeb5   : > { %v900_v0 = vadd.f32 1.0, %v1635_v1 }
 0xeb7   : > { %1636 = vrcp.f32 %v900_v0 }
 0xec1   : > { %v1637_v7 = vpop.eup %1636 }
 0xec2   : > { %v904_v48 = vmul.f32 %v1637_v7, %v802_v36 }
 0xf25   : > { %v907_v46 = vpop.permute.xlu1 %906 }
 0xf26   : > { %v909_v47 = vmul.f32 %v1637_v7, %v907_v46 }
 0xf28   : > { %911 = vrot.lane.b32.xlu0 %v909_v47, %s1684_s25 }
 0xf9a   : > { %v912_v49 = vpop.permute.xlu0 %911 }
 0xf9b   : > { %v914_v50 = vadd.f32 %v912_v49, %v904_v48 }
 0xf9d   : > { %1638 = vtanh.f32 %v914_v50 }
 0xfa7   : > { %v1639_v51 = vpop.eup %1638 }
 0xfa8   : > { %917 = vrot.lane.b32.xlu1 %v1639_v51, %s1683_s24 }
0x101a   : > { %v918_v52 = vpop.permute.xlu1 %917 }
0x101b   : > { %v920_v53 = vmul.f32 %v1637_v7, %v918_v52 }
0x101d   : > { %922 = vrot.lane.b32.xlu0 %v920_v53, %s1684_s25 }
0x108f   : > { %v923_v54 = vpop.permute.xlu0 %922 }
0x1090   : > { %926 = vst.msk [vmem:[%s925_s9] sm:$0x3] %vm243_vm0, %v923_v54  ;;  %1501 = vmatmul.mubr.msk.f32.vlgmr.msra.gmra.mrb[6].mxu0 %vm256_vm2, %v923_v54 }
0x1163   : > { %v1004_v56 = vpop.f32.mrb[6].mxu0 }
0x1164   : > { %v1008_v57 = vadd.f32 %v1004_v56, %v931_v55  ;;  %v1502_v58 = vpop.f32.mrb[7].mxu0 }
0x1166   : > { %1640 = vtanh.f32 %v1008_v57  ;;  %v1377_v60 = vmul.f32 -1.442695, %v1008_v57 }
0x1168   : > { %1642 = vpow2.f32 %v1377_v60 }
0x1170   : > { %v1641_v59 = vpop.eup %1640 }
0x1171   : > { %1018 = vrot.lane.b32.xlu1 %v1641_v59, %s1683_s24 }
0x1172   : > { %v1643_v61 = vpop.eup %1642 }
0x1173   : > { %v1012_v62 = vadd.f32 1.0, %v1643_v61 }
0x1175   : > { %1644 = vrcp.f32 %v1012_v62 }
0x117f   : > { %v1645_v63 = vpop.eup %1644 }
0x1180   : > { %v1016_v4 = vmul.f32 %v1645_v63, %v914_v50 }
0x11e3   : > { %v1019_v2 = vpop.permute.xlu1 %1018 }
0x11e4   : > { %v1021_v3 = vmul.f32 %v1645_v63, %v1019_v2 }
0x11e6   : > { %1023 = vrot.lane.b32.xlu0 %v1021_v3, %s1684_s25 }
0x1258   : > { %v1024_v6 = vpop.permute.xlu0 %1023 }
0x1259   : > { %v1026_v8 = vadd.f32 %v1024_v6, %v1016_v4 }
0x125b   : > { %1646 = vtanh.f32 %v1026_v8 }
0x1265   : > { %v1647_v9 = vpop.eup %1646 }
0x1266   : > { %1029 = vrot.lane.b32.xlu1 %v1647_v9, %s1683_s24 }
0x12d8   : > { %v1030_v10 = vpop.permute.xlu1 %1029 }
0x12d9   : > { %v1032_v11 = vmul.f32 %v1645_v63, %v1030_v10 }
0x12db   : > { %1034 = vrot.lane.b32.xlu0 %v1032_v11, %s1684_s25 }
0x134d   : > { %v1035_v12 = vpop.permute.xlu0 %1034 }
0x134e   : > { %1038 = vst.msk [vmem:[%s1037_s17] sm:$0x3] %vm243_vm0, %v1035_v12  ;;  %1512 = vmatmul.mubr.msk.f32.vlgmr.msra.gmra.mrb[6].mxu1 %vm256_vm2, %v1035_v12 }
0x1421   : > { %v1116_v14 = vpop.f32.mrb[6].mxu1 }
0x1422   : > { %v1120_v15 = vadd.f32 %v1116_v14, %v1043_v13  ;;  %v1513_v16 = vpop.f32.mrb[7].mxu1 }
0x1424   : > { %1648 = vtanh.f32 %v1120_v15  ;;  %v1380_v18 = vmul.f32 -1.442695, %v1120_v15 }
0x1426   : > { %1650 = vpow2.f32 %v1380_v18 }
0x142e   : > { %v1649_v17 = vpop.eup %1648 }
0x142f   : > { %1130 = vrot.lane.b32.xlu1 %v1649_v17, %s1683_s24 }
0x1430   : > { %v1651_v19 = vpop.eup %1650 }
0x1431   : > { %v1124_v20 = vadd.f32 1.0, %v1651_v19 }
0x1433   : > { %1652 = vrcp.f32 %v1124_v20 }
0x143d   : > { %v1653_v21 = vpop.eup %1652 }
0x143e   : > { %v1128_v24 = vmul.f32 %v1653_v21, %v1026_v8 }
0x14a1   : > { %v1131_v22 = vpop.permute.xlu1 %1130 }
0x14a2   : > { %v1133_v23 = vmul.f32 %v1653_v21, %v1131_v22 }
0x14a4   : > { %1135 = vrot.lane.b32.xlu0 %v1133_v23, %s1684_s25 }
0x1516   : > { %v1136_v25 = vpop.permute.xlu0 %1135 }
0x1517   : > { %v1138_v26 = vadd.f32 %v1136_v25, %v1128_v24 }
0x1519   : > { %1654 = vtanh.f32 %v1138_v26 }
0x1523   : > { %v1655_v27 = vpop.eup %1654 }
0x1524   : > { %1141 = vrot.lane.b32.xlu1 %v1655_v27, %s1683_s24 }
0x1528   : > { %1153 = vrot.lane.b32.xlu1 %v1138_v26, %s1685_s22 }
0x1596   : > { %v1142_v28 = vpop.permute.xlu1 %1141 }
0x1597   : > { %v1144_v29 = vmul.f32 %v1653_v21, %v1142_v28 }
0x1599   : > { %1146 = vrot.lane.b32.xlu0 %v1144_v29, %s1684_s25 }
0x159a   : > { %v1154_v30 = vpop.permute.xlu1 %1153 }
0x159b   : > { %1156 = vst.msk [vmem:[#allocation3] sm:$0x3] %vm243_vm0, %v1154_v30 }
0x160b   : > { %v1147_v31 = vpop.permute.xlu0 %1146 }
0x160c   : > { %1150 = vst.msk [vmem:[%s1149_s3] sm:$0x3] %vm243_vm0, %v1147_v31  ;;  %1151 = vst.msk [vmem:[#allocation2] sm:$0x3] %vm243_vm0, %v1147_v31 }
0x160d PF: > { %s12_s11 = sadd.s32 1, %s1678_s11   ;;  %s1930_s9 = smov %s1674_s10 }
0x160e   : > { %p9_p5 = scmp.ge.s32.totalorder %s12_s11, 4   ;;  %s1931_s10 = smov %s1933_s12 }
0x1610   :  { %11 = sbr.rel (!%p9_p5) target bundleno = 2 (0x2), region = 81 }

</bundles_post_ra>
